<compile_context>
chip_gen: v7x
topology: tpu7x:2x2x1
jax: 0.10.0
libtpu: 0.0.40
codegen_flags: <defaults>
</compile_context>

<pallas_src>
import functools

import jax
import jax.numpy as jnp
from jax.experimental import pallas as pl
from jax.experimental.pallas import tpu as pltpu


def _round_up(n, m):
    return ((n + m - 1) // m) * m


# ---------------------------------------------------------------------------
# Kernel: fused 3-layer MLP, one batch tile per grid step.
# Weights arrive in their compute dtype (bf16 or f32); all accumulation,
# bias adds and ReLUs are f32.
# ---------------------------------------------------------------------------
def _q_mlp_kernel(x_ref, w1_ref, b1_ref, w2_ref, b2_ref, w3_ref, b3_ref, o_ref):
    cdt = w1_ref.dtype  # MXU operand dtype (bf16 by default)

    h = jnp.dot(x_ref[...].astype(cdt), w1_ref[...],
                preferred_element_type=jnp.float32)
    h = jnp.maximum(h + b1_ref[...], 0.0)

    h = jnp.dot(h.astype(cdt), w2_ref[...],
                preferred_element_type=jnp.float32)
    h = jnp.maximum(h + b2_ref[...], 0.0)

    q = jnp.dot(h.astype(cdt), w3_ref[...],
                preferred_element_type=jnp.float32) + b3_ref[...]
    o_ref[...] = q.astype(o_ref.dtype)


# ---------------------------------------------------------------------------
# Wrapper
# ---------------------------------------------------------------------------
@functools.partial(
    jax.jit,
    static_argnames=("block_b", "matmul_dtype", "single_buffer_weights"))
def _q_forward_impl(x, params, *, block_b, matmul_dtype, single_buffer_weights):
    w1, b1 = params["w1"], params["b1"]
    w2, b2 = params["w2"], params["b2"]
    w3, b3 = params["w3"], params["b3"]

    B, S = x.shape
    H = w1.shape[1]
    A = w3.shape[1]

    # ---- Lane-dense padding of H and A to multiples of 128 (numerically exact:
    # zero weight rows/cols + zero bias + ReLU(0)=0 contribute nothing). ----
    H_pad = _round_up(H, 128)
    A_pad = _round_up(A, 128)
    if H_pad != H:
        w1 = jnp.pad(w1, ((0, 0), (0, H_pad - H)))
        b1 = jnp.pad(b1, ((0, H_pad - H),))
        w2 = jnp.pad(w2, ((0, H_pad - H), (0, H_pad - H)))
        b2 = jnp.pad(b2, ((0, H_pad - H),))
        w3 = jnp.pad(w3, ((0, H_pad - H), (0, 0)))
    if A_pad != A:
        w3 = jnp.pad(w3, ((0, 0), (0, A_pad - A)))
        b3 = jnp.pad(b3, ((0, A_pad - A),))

    # Cast weights ONCE here (not per grid step) to the MXU operand dtype.
    w1 = w1.astype(matmul_dtype)
    w2 = w2.astype(matmul_dtype)
    w3 = w3.astype(matmul_dtype)
    # Biases as (1, N) f32 rows: lane-aligned, free sublane broadcast.
    b1r = b1.reshape(1, H_pad).astype(jnp.float32)
    b2r = b2.reshape(1, H_pad).astype(jnp.float32)
    b3r = b3.reshape(1, A_pad).astype(jnp.float32)

    # ---- Balanced batch tiling: padding waste bounded by one sublane group
    # per tile (avoids e.g. B=520, block_b=512 -> B_pad=1024). ----
    blk = max(8, min(block_b, _round_up(B, 8)))
    n_tiles = -(-B // blk)
    TB = _round_up(-(-B // n_tiles), 8)
    B_pad = _round_up(B, TB)
    if B_pad != B:
        x = jnp.pad(x, ((0, B_pad - B), (0, 0)))
    n_steps = B_pad // TB

    # ---- BlockSpecs ----
    def _tiled(shape):            # batch-tiled operands (x, out)
        return pl.BlockSpec(shape, lambda i: (i, 0))

    def _resident(shape):         # weights/biases: same block every step
        if single_buffer_weights:
            # Constant index_map -> the default double buffer is pure VMEM
            # waste; request a single buffer.
            return pl.BlockSpec(shape, lambda i: (0, 0),
                                pipeline_mode=pl.Buffered(1))
        return pl.BlockSpec(shape, lambda i: (0, 0))

    # ---- Explicit scoped-VMEM budget (defaults are 16/32 MiB, below what
    # larger H or TB needs). ----
    wbytes = jnp.dtype(matmul_dtype).itemsize
    weight_bufs = 1 if single_buffer_weights else 2
    vmem_needed = (
        weight_bufs * ((S * H_pad + H_pad * H_pad + H_pad * A_pad) * wbytes
                       + (2 * H_pad + A_pad) * 4)     # resident weights + biases
        + 2 * TB * S * 4                              # double-buffered x tiles
        + 2 * TB * A_pad * 4                          # double-buffered out tiles
        + 3 * TB * H_pad * 4                          # live f32 intermediates
    )
    vmem_limit = int(min(128 << 20, max(32 << 20, int(vmem_needed * 1.5) + (2 << 20))))

    compiler_params = pltpu.CompilerParams(
        # Only shard across TensorCores when there are >= 2 steps; a 1-step
        # grid would just duplicate the resident-weight fetch per core.
        dimension_semantics=(("parallel",) if n_steps > 1 else ("arbitrary",)),
        vmem_limit_bytes=vmem_limit,
    )

    out_padded = pl.pallas_call(
        _q_mlp_kernel,
        out_shape=jax.ShapeDtypeStruct((B_pad, A_pad), jnp.float32),
        grid=(n_steps,),
        in_specs=[
            _tiled((TB, S)),
            _resident((S, H_pad)),
            _resident((1, H_pad)),
            _resident((H_pad, H_pad)),
            _resident((1, H_pad)),
            _resident((H_pad, A_pad)),
            _resident((1, A_pad)),
        ],
        out_specs=_tiled((TB, A_pad)),
        compiler_params=compiler_params,
    )(x, w1, b1r, w2, b2r, w3, b3r)

    return out_padded[:B, :A]


def q_forward(x, params, *, block_b=512, matmul_dtype=jnp.bfloat16):
    """Forward pass of Q: fc3(relu(fc2(relu(fc1(x)))))  ->  [B, action_dim] f32."""
    try:
        out = _q_forward_impl(x, params, block_b=block_b,
                              matmul_dtype=matmul_dtype,
                              single_buffer_weights=True)
        return jax.block_until_ready(out)
    except Exception:
        # Fallback for JAX builds that reject pipeline_mode=pl.Buffered(1):
        # identical kernel with default double-buffered resident weights.
        out = _q_forward_impl(x, params, block_b=block_b,
                              matmul_dtype=matmul_dtype,
                              single_buffer_weights=False)
        return jax.block_until_ready(out)


# ---------------------------------------------------------------------------
# Parameter init (mimics nn.Linear's U(-1/sqrt(fan_in), 1/sqrt(fan_in))),
# stored as (in_features, out_features) so y = x @ W + b.
# ---------------------------------------------------------------------------
def init_params(key, state_dim, action_dim, hidden_dim):
    def linear(key, fan_in, fan_out):
        kw, kb = jax.random.split(key)
        bound = 1.0 / jnp.sqrt(fan_in)
        w = jax.random.uniform(kw, (fan_in, fan_out), jnp.float32, -bound, bound)
        b = jax.random.uniform(kb, (fan_out,), jnp.float32, -bound, bound)
        return w, b

    k1, k2, k3 = jax.random.split(key, 3)
    w1, b1 = linear(k1, state_dim, hidden_dim)    # fc1
    w2, b2 = linear(k2, hidden_dim, hidden_dim)   # fc2
    w3, b3 = linear(k3, hidden_dim, action_dim)   # fc3
    return dict(w1=w1, b1=b1, w2=w2, b2=b2, w3=w3, b3=b3)


# Pure-JAX reference (optionally with bf16 matmul operands to match the kernel)
def ref_forward(x, p, matmul_dtype=jnp.float32):
    def dot(a, w):
        return jnp.dot(a.astype(matmul_dtype), w.astype(matmul_dtype),
                       preferred_element_type=jnp.float32)
    h = jax.nn.relu(dot(x, p["w1"]) + p["b1"])
    h = jax.nn.relu(dot(h, p["w2"]) + p["b2"])
    return dot(h, p["w3"]) + p["b3"]


# ---------------------------------------------------------------------------
if __name__ == "__main__":
    B, STATE, HIDDEN, ACTION = 8, 16, 32, 4

    key = jax.random.PRNGKey(0)
    kp, kx = jax.random.split(key)
    params = init_params(kp, STATE, ACTION, HIDDEN)
    x = jax.random.normal(kx, (B, STATE), jnp.float32)

    # Default path: bf16 MXU operands, f32 accumulate / bias / ReLU.
    q = q_forward(x, params)
    assert q.shape == (B, ACTION)
    assert jnp.allclose(q, ref_forward(x, params, jnp.bfloat16),
                        atol=1e-3, rtol=1e-3), "mismatch vs bf16-matched reference"
    assert jnp.allclose(q, ref_forward(x, params),
                        atol=5e-2, rtol=5e-2), "mismatch vs f32 reference (loose)"

    # Full-f32 operand path: tight check of the padding / fusion logic.
    q32 = q_forward(x, params, matmul_dtype=jnp.float32)
    assert jnp.allclose(q32, ref_forward(x, params), atol=1e-5), "mismatch (f32 path)"

    # Batch that forces padding and multiple (balanced) grid steps.
    x_big = jax.random.normal(kx, (37, STATE), jnp.float32)
    q_big = q_forward(x_big, params, block_b=16)
    assert q_big.shape == (37, ACTION)
    assert jnp.allclose(q_big, ref_forward(x_big, params, jnp.bfloat16),
                        atol=1e-3, rtol=1e-3), "mismatch (tiled batch)"

    print("KERNEL_OK")
</pallas_src>

<mosaic_0001>
module attributes {stable_mosaic.version = 11 : i64} {
  func.func @_q_mlp_kernel(%arg0: i32, %arg1: memref<8x16xf32, #tpu.memory_space<vmem>>, %arg2: memref<16x128xbf16, #tpu.memory_space<vmem>>, %arg3: memref<1x128xf32, #tpu.memory_space<vmem>>, %arg4: memref<128x128xbf16, #tpu.memory_space<vmem>>, %arg5: memref<1x128xf32, #tpu.memory_space<vmem>>, %arg6: memref<128x128xbf16, #tpu.memory_space<vmem>>, %arg7: memref<1x128xf32, #tpu.memory_space<vmem>>, %arg8: memref<8x128xf32, #tpu.memory_space<vmem>>) attributes {dimension_semantics = [#tpu.dimension_semantics<arbitrary>], iteration_bounds = array<i64: 1>, scalar_prefetch = 0 : i64, scratch_operands = 0 : i64, tpu.core_type = #tpu.core_type<tc>, window_params = [{transform_indices = @transform_0, window_bounds = array<i64: 8, 16>}, {pipeline_mode = #tpu.pipeline_mode<synchronous>, transform_indices = @transform_1, window_bounds = array<i64: 16, 128>}, {pipeline_mode = #tpu.pipeline_mode<synchronous>, transform_indices = @transform_2, window_bounds = array<i64: 1, 128>}, {pipeline_mode = #tpu.pipeline_mode<synchronous>, transform_indices = @transform_3, window_bounds = array<i64: 128, 128>}, {pipeline_mode = #tpu.pipeline_mode<synchronous>, transform_indices = @transform_4, window_bounds = array<i64: 1, 128>}, {pipeline_mode = #tpu.pipeline_mode<synchronous>, transform_indices = @transform_5, window_bounds = array<i64: 128, 128>}, {pipeline_mode = #tpu.pipeline_mode<synchronous>, transform_indices = @transform_6, window_bounds = array<i64: 1, 128>}, {transform_indices = @transform_7, window_bounds = array<i64: 8, 128>}]} {
    %c0 = arith.constant 0 : index
    %c0_0 = arith.constant 0 : index
    %0 = vector.load %arg1[%c0, %c0_0] : memref<8x16xf32, #tpu.memory_space<vmem>>, vector<8x16xf32>
    %1 = arith.truncf %0 : vector<8x16xf32> to vector<8x16xbf16>
    %c0_1 = arith.constant 0 : index
    %c0_2 = arith.constant 0 : index
    %2 = vector.load %arg2[%c0_1, %c0_2] : memref<16x128xbf16, #tpu.memory_space<vmem>>, vector<16x128xbf16>
    %cst = arith.constant dense<0.000000e+00> : vector<8x128xf32>
    %3 = tpu.matmul %1, %2, %cst {dimension_numbers = #tpu.dot_dimension_numbers<[1], [0], [0], [1], [0, 0, 1, 1], [], []>} : vector<8x16xbf16>, vector<16x128xbf16>, vector<8x128xf32> -> vector<8x128xf32>
    %c0_3 = arith.constant 0 : index
    %c0_4 = arith.constant 0 : index
    %4 = vector.load %arg3[%c0_3, %c0_4] : memref<1x128xf32, #tpu.memory_space<vmem>>, vector<1x128xf32>
    %5 = vector.broadcast %4 : vector<1x128xf32> to vector<8x128xf32>
    %6 = arith.addf %3, %5 : vector<8x128xf32>
    %cst_5 = arith.constant 0.000000e+00 : f32
    %7 = vector.broadcast %cst_5 : f32 to vector<8x128xf32>
    %8 = arith.maximumf %6, %7 : vector<8x128xf32>
    %9 = arith.truncf %8 : vector<8x128xf32> to vector<8x128xbf16>
    %c0_6 = arith.constant 0 : index
    %c0_7 = arith.constant 0 : index
    %10 = vector.load %arg4[%c0_6, %c0_7] : memref<128x128xbf16, #tpu.memory_space<vmem>>, vector<128x128xbf16>
    %cst_8 = arith.constant dense<0.000000e+00> : vector<8x128xf32>
    %11 = tpu.matmul %9, %10, %cst_8 {dimension_numbers = #tpu.dot_dimension_numbers<[1], [0], [0], [1], [0, 0, 1, 1], [], []>} : vector<8x128xbf16>, vector<128x128xbf16>, vector<8x128xf32> -> vector<8x128xf32>
    %c0_9 = arith.constant 0 : index
    %c0_10 = arith.constant 0 : index
    %12 = vector.load %arg5[%c0_9, %c0_10] : memref<1x128xf32, #tpu.memory_space<vmem>>, vector<1x128xf32>
    %13 = vector.broadcast %12 : vector<1x128xf32> to vector<8x128xf32>
    %14 = arith.addf %11, %13 : vector<8x128xf32>
    %cst_11 = arith.constant 0.000000e+00 : f32
    %15 = vector.broadcast %cst_11 : f32 to vector<8x128xf32>
    %16 = arith.maximumf %14, %15 : vector<8x128xf32>
    %17 = arith.truncf %16 : vector<8x128xf32> to vector<8x128xbf16>
    %c0_12 = arith.constant 0 : index
    %c0_13 = arith.constant 0 : index
    %18 = vector.load %arg6[%c0_12, %c0_13] : memref<128x128xbf16, #tpu.memory_space<vmem>>, vector<128x128xbf16>
    %cst_14 = arith.constant dense<0.000000e+00> : vector<8x128xf32>
    %19 = tpu.matmul %17, %18, %cst_14 {dimension_numbers = #tpu.dot_dimension_numbers<[1], [0], [0], [1], [0, 0, 1, 1], [], []>} : vector<8x128xbf16>, vector<128x128xbf16>, vector<8x128xf32> -> vector<8x128xf32>
    %c0_15 = arith.constant 0 : index
    %c0_16 = arith.constant 0 : index
    %20 = vector.load %arg7[%c0_15, %c0_16] : memref<1x128xf32, #tpu.memory_space<vmem>>, vector<1x128xf32>
    %21 = vector.broadcast %20 : vector<1x128xf32> to vector<8x128xf32>
    %22 = arith.addf %19, %21 : vector<8x128xf32>
    %c0_17 = arith.constant 0 : index
    %c0_18 = arith.constant 0 : index
    %23 = vector.load %arg8[%c0_17, %c0_18] : memref<8x128xf32, #tpu.memory_space<vmem>>, vector<8x128xf32>
    tpu.vector_store %arg8[%c0_17, %c0_18], %22 {strides = array<i32>} : memref<8x128xf32, #tpu.memory_space<vmem>>, vector<8x128xf32>,
    return
  }
  func.func @transform_0(%arg0: i32) -> (i32, i32) {
    %c0_i32 = arith.constant 0 : i32
    %c0_i32_0 = arith.constant 0 : i32
    return %arg0, %c0_i32 : i32, i32
  }
  func.func @transform_1(%arg0: i32) -> (i32, i32) {
    %c0_i32 = arith.constant 0 : i32
    %c0_i32_0 = arith.constant 0 : i32
    %c0_i32_1 = arith.constant 0 : i32
    return %c0_i32, %c0_i32_0 : i32, i32
  }
  func.func @transform_2(%arg0: i32) -> (i32, i32) {
    %c0_i32 = arith.constant 0 : i32
    %c0_i32_0 = arith.constant 0 : i32
    %c0_i32_1 = arith.constant 0 : i32
    return %c0_i32, %c0_i32_0 : i32, i32
  }
  func.func @transform_3(%arg0: i32) -> (i32, i32) {
    %c0_i32 = arith.constant 0 : i32
    %c0_i32_0 = arith.constant 0 : i32
    %c0_i32_1 = arith.constant 0 : i32
    return %c0_i32, %c0_i32_0 : i32, i32
  }
  func.func @transform_4(%arg0: i32) -> (i32, i32) {
    %c0_i32 = arith.constant 0 : i32
    %c0_i32_0 = arith.constant 0 : i32
    %c0_i32_1 = arith.constant 0 : i32
    return %c0_i32, %c0_i32_0 : i32, i32
  }
  func.func @transform_5(%arg0: i32) -> (i32, i32) {
    %c0_i32 = arith.constant 0 : i32
    %c0_i32_0 = arith.constant 0 : i32
    %c0_i32_1 = arith.constant 0 : i32
    return %c0_i32, %c0_i32_0 : i32, i32
  }
  func.func @transform_6(%arg0: i32) -> (i32, i32) {
    %c0_i32 = arith.constant 0 : i32
    %c0_i32_0 = arith.constant 0 : i32
    %c0_i32_1 = arith.constant 0 : i32
    return %c0_i32, %c0_i32_0 : i32, i32
  }
  func.func @transform_7(%arg0: i32) -> (i32, i32) {
    %c0_i32 = arith.constant 0 : i32
    %c0_i32_0 = arith.constant 0 : i32
    return %arg0, %c0_i32 : i32, i32
  }
}

module attributes {stable_mosaic.version = 11 : i64} {
  func.func @_q_mlp_kernel(%arg0: i32, %arg1: memref<8x16xf32, #tpu.memory_space<vmem>>, %arg2: memref<16x128xbf16, #tpu.memory_space<vmem>>, %arg3: memref<1x128xf32, #tpu.memory_space<vmem>>, %arg4: memref<128x128xbf16, #tpu.memory_space<vmem>>, %arg5: memref<1x128xf32, #tpu.memory_space<vmem>>, %arg6: memref<128x128xbf16, #tpu.memory_space<vmem>>, %arg7: memref<1x128xf32, #tpu.memory_space<vmem>>, %arg8: memref<8x128xf32, #tpu.memory_space<vmem>>) attributes {dimension_semantics = [#tpu.dimension_semantics<arbitrary>], iteration_bounds = array<i64: 1>, scalar_prefetch = 0 : i64, scratch_operands = 0 : i64, tpu.core_type = #tpu.core_type<tc>, window_params = [{transform_indices = @transform_0, window_bounds = array<i64: 8, 16>}, {pipeline_mode = #tpu.pipeline_mode<synchronous>, transform_indices = @transform_1, window_bounds = array<i64: 16, 128>}, {pipeline_mode = #tpu.pipeline_mode<synchronous>, transform_indices = @transform_2, window_bounds = array<i64: 1, 128>}, {pipeline_mode = #tpu.pipeline_mode<synchronous>, transform_indices = @transform_3, window_bounds = array<i64: 128, 128>}, {pipeline_mode = #tpu.pipeline_mode<synchronous>, transform_indices = @transform_4, window_bounds = array<i64: 1, 128>}, {pipeline_mode = #tpu.pipeline_mode<synchronous>, transform_indices = @transform_5, window_bounds = array<i64: 128, 128>}, {pipeline_mode = #tpu.pipeline_mode<synchronous>, transform_indices = @transform_6, window_bounds = array<i64: 1, 128>}, {transform_indices = @transform_7, window_bounds = array<i64: 8, 128>}]} {
    %c0 = arith.constant 0 : index
    %c0_0 = arith.constant 0 : index
    %0 = vector.load %arg1[%c0, %c0_0] : memref<8x16xf32, #tpu.memory_space<vmem>>, vector<8x16xf32>
    %1 = arith.truncf %0 : vector<8x16xf32> to vector<8x16xbf16>
    %c0_1 = arith.constant 0 : index
    %c0_2 = arith.constant 0 : index
    %2 = vector.load %arg2[%c0_1, %c0_2] : memref<16x128xbf16, #tpu.memory_space<vmem>>, vector<16x128xbf16>
    %cst = arith.constant dense<0.000000e+00> : vector<8x128xf32>
    %3 = tpu.matmul %1, %2, %cst {dimension_numbers = #tpu.dot_dimension_numbers<[1], [0], [0], [1], [0, 0, 1, 1], [], []>} : vector<8x16xbf16>, vector<16x128xbf16>, vector<8x128xf32> -> vector<8x128xf32>
    %c0_3 = arith.constant 0 : index
    %c0_4 = arith.constant 0 : index
    %4 = vector.load %arg3[%c0_3, %c0_4] : memref<1x128xf32, #tpu.memory_space<vmem>>, vector<1x128xf32>
    %5 = vector.broadcast %4 : vector<1x128xf32> to vector<8x128xf32>
    %6 = arith.addf %3, %5 : vector<8x128xf32>
    %cst_5 = arith.constant 0.000000e+00 : f32
    %7 = vector.broadcast %cst_5 : f32 to vector<8x128xf32>
    %8 = arith.maximumf %6, %7 : vector<8x128xf32>
    %9 = arith.truncf %8 : vector<8x128xf32> to vector<8x128xbf16>
    %c0_6 = arith.constant 0 : index
    %c0_7 = arith.constant 0 : index
    %10 = vector.load %arg4[%c0_6, %c0_7] : memref<128x128xbf16, #tpu.memory_space<vmem>>, vector<128x128xbf16>
    %cst_8 = arith.constant dense<0.000000e+00> : vector<8x128xf32>
    %11 = tpu.matmul %9, %10, %cst_8 {dimension_numbers = #tpu.dot_dimension_numbers<[1], [0], [0], [1], [0, 0, 1, 1], [], []>} : vector<8x128xbf16>, vector<128x128xbf16>, vector<8x128xf32> -> vector<8x128xf32>
    %c0_9 = arith.constant 0 : index
    %c0_10 = arith.constant 0 : index
    %12 = vector.load %arg5[%c0_9, %c0_10] : memref<1x128xf32, #tpu.memory_space<vmem>>, vector<1x128xf32>
    %13 = vector.broadcast %12 : vector<1x128xf32> to vector<8x128xf32>
    %14 = arith.addf %11, %13 : vector<8x128xf32>
    %cst_11 = arith.constant 0.000000e+00 : f32
    %15 = vector.broadcast %cst_11 : f32 to vector<8x128xf32>
    %16 = arith.maximumf %14, %15 : vector<8x128xf32>
    %17 = arith.truncf %16 : vector<8x128xf32> to vector<8x128xbf16>
    %c0_12 = arith.constant 0 : index
    %c0_13 = arith.constant 0 : index
    %18 = vector.load %arg6[%c0_12, %c0_13] : memref<128x128xbf16, #tpu.memory_space<vmem>>, vector<128x128xbf16>
    %cst_14 = arith.constant dense<0.000000e+00> : vector<8x128xf32>
    %19 = tpu.matmul %17, %18, %cst_14 {dimension_numbers = #tpu.dot_dimension_numbers<[1], [0], [0], [1], [0, 0, 1, 1], [], []>} : vector<8x128xbf16>, vector<128x128xbf16>, vector<8x128xf32> -> vector<8x128xf32>
    %c0_15 = arith.constant 0 : index
    %c0_16 = arith.constant 0 : index
    %20 = vector.load %arg7[%c0_15, %c0_16] : memref<1x128xf32, #tpu.memory_space<vmem>>, vector<1x128xf32>
    %21 = vector.broadcast %20 : vector<1x128xf32> to vector<8x128xf32>
    %22 = arith.addf %19, %21 : vector<8x128xf32>
    %c0_17 = arith.constant 0 : index
    %c0_18 = arith.constant 0 : index
    %23 = vector.load %arg8[%c0_17, %c0_18] : memref<8x128xf32, #tpu.memory_space<vmem>>, vector<8x128xf32>
    tpu.vector_store %arg8[%c0_17, %c0_18], %22 {strides = array<i32>} : memref<8x128xf32, #tpu.memory_space<vmem>>, vector<8x128xf32>,
    return
  }
  func.func @transform_0(%arg0: i32) -> (i32, i32) {
    %c0_i32 = arith.constant 0 : i32
    %c0_i32_0 = arith.constant 0 : i32
    return %arg0, %c0_i32 : i32, i32
  }
  func.func @transform_1(%arg0: i32) -> (i32, i32) {
    %c0_i32 = arith.constant 0 : i32
    %c0_i32_0 = arith.constant 0 : i32
    %c0_i32_1 = arith.constant 0 : i32
    return %c0_i32, %c0_i32_0 : i32, i32
  }
  func.func @transform_2(%arg0: i32) -> (i32, i32) {
    %c0_i32 = arith.constant 0 : i32
    %c0_i32_0 = arith.constant 0 : i32
    %c0_i32_1 = arith.constant 0 : i32
    return %c0_i32, %c0_i32_0 : i32, i32
  }
  func.func @transform_3(%arg0: i32) -> (i32, i32) {
    %c0_i32 = arith.constant 0 : i32
    %c0_i32_0 = arith.constant 0 : i32
    %c0_i32_1 = arith.constant 0 : i32
    return %c0_i32, %c0_i32_0 : i32, i32
  }
  func.func @transform_4(%arg0: i32) -> (i32, i32) {
    %c0_i32 = arith.constant 0 : i32
    %c0_i32_0 = arith.constant 0 : i32
    %c0_i32_1 = arith.constant 0 : i32
    return %c0_i32, %c0_i32_0 : i32, i32
  }
  func.func @transform_5(%arg0: i32) -> (i32, i32) {
    %c0_i32 = arith.constant 0 : i32
    %c0_i32_0 = arith.constant 0 : i32
    %c0_i32_1 = arith.constant 0 : i32
    return %c0_i32, %c0_i32_0 : i32, i32
  }
  func.func @transform_6(%arg0: i32) -> (i32, i32) {
    %c0_i32 = arith.constant 0 : i32
    %c0_i32_0 = arith.constant 0 : i32
    %c0_i32_1 = arith.constant 0 : i32
    return %c0_i32, %c0_i32_0 : i32, i32
  }
  func.func @transform_7(%arg0: i32) -> (i32, i32) {
    %c0_i32 = arith.constant 0 : i32
    %c0_i32_0 = arith.constant 0 : i32
    return %arg0, %c0_i32 : i32, i32
  }
}

</mosaic_0001>

<bundles_post_ra>
// kernel: _q_forward_impl.1
= control target key start
LH: loop header
LB: loop body
LE: loop exit
PB: predicated region body
PF: predicated region fallthrough
CT: control target
= control target key end

     0   :  { %v425_v0 = vmov 0.0   ;;  %vm426_vm0 = vmmov 0   ;;  %vm44_vm1 = vcmask 130048   ;;  %s553_s1 = inlined_call_operand.vmem [shape: bf16[16,128], index: 1, kind: input, shape index: {}]   ;;  %s554_s0 = inlined_call_operand.vmem [shape: f32[8,16], index: 0, kind: input, shape index: {}]   ;;  %s555_s3 = inlined_call_operand.vmem [shape: bf16[128,128], index: 3, kind: input, shape index: {}]   ;;  %s556_s5 = inlined_call_operand.vmem [shape: bf16[128,128], index: 5, kind: input, shape index: {}]   ;;  %s557_s2 = inlined_call_operand.vmem [shape: f32[1,128], index: 2, kind: input, shape index: {}]   ;;  %s558_s4 = inlined_call_operand.vmem [shape: f32[1,128], index: 4, kind: input, shape index: {}]   ;;  %s559_s6 = inlined_call_operand.vmem [shape: f32[1,128], index: 6, kind: input, shape index: {}]   ;;  %s560_s7 = inlined_call_operand.vmem [shape: f32[8,128], index: 7, kind: output, shape index: {}]  }
   0x1   :  { %360 = vmatprep.subr.bf16.mxu0 %v425_v0  ;;  %v408_v1 = vld [vmem:[%s553_s1] sm:$0xff]   ;;  %362 = vmatprep.mubr.msk.bf16.mxu0 %vm426_vm0, %v425_v0  ;;  %v410_v5 = vld [vmem:[%s555_s3 + $0x8] sm:$0xff]   ;;  %v411_v6 = vld [vmem:[%s555_s3 + $0x10] sm:$0xff]  }
   0x2   :  { %v27_v2 = vld [vmem:[%s554_s0] sm:$0xff]  ;;  %366 = vmatprep.subr.bf16.mxu1 %v425_v0  ;;  %382 = vmatprep.mubr.msk.bf16.mxu1 %vm426_vm0, %v425_v0  ;;  %v412_v7 = vld [vmem:[%s555_s3 + $0x18] sm:$0xff]   ;;  %v414_v9 = vld [vmem:[%s555_s3 + $0x28] sm:$0xff]  }
   0x3   :  { %361 = vmatpush3.bf16.msra.mxu0 %v408_v1  ;;  %v28_v3 = vpack.c.bf16 %v27_v2, %v27_v2  ;;  %v409_v4 = vld [vmem:[%s555_s3] sm:$0xff]   ;;  %v415_v10 = vld [vmem:[%s555_s3 + $0x30] sm:$0xff]   ;;  %v416_v11 = vld [vmem:[%s555_s3 + $0x38] sm:$0xff]  }
   0x4   :  { %386 = vmatprep.subr.bf16.mxu0 %v425_v0  ;;  %367 = vmatpush3.bf16.msra.mxu1 %v409_v4  ;;  %v413_v8 = vld [vmem:[%s555_s3 + $0x20] sm:$0xff]   ;;  %v418_v13 = vld [vmem:[%s556_s5 + $0x8] sm:$0xff]   ;;  %v419_v14 = vld [vmem:[%s556_s5 + $0x10] sm:$0xff]  }
   0x5   :  { %368 = vmatprep.subr.bf16.mxu1 %v425_v0  ;;  %v417_v12 = vld [vmem:[%s556_s5] sm:$0xff]   ;;  %v420_v15 = vld [vmem:[%s556_s5 + $0x18] sm:$0xff]   ;;  %v422_v17 = vld [vmem:[%s556_s5 + $0x28] sm:$0xff]  }
   0x6   :  { %363 = vmatmul.mubr.msk.bf16.vlgmr.msra.gmra.mrb[0].mxu0 %vm44_vm1, %v28_v3  ;;  %v421_v16 = vld [vmem:[%s556_s5 + $0x20] sm:$0xff]   ;;  %v423_v26 = vld [vmem:[%s556_s5 + $0x30] sm:$0xff]   ;;  %v424_v27 = vld [vmem:[%s556_s5 + $0x38] sm:$0xff]  }
   0x7   :  { %402 = vmatprep.mubr.msk.bf16.mxu0 %vm426_vm0, %v425_v0  ;;  %387 = vmatpush3.bf16.msra.mxu0 %v417_v12  ;;  %v319_v18 = vld [vmem:[%s557_s2] ss:$0 sm:$0xff] }
   0x8   :  { %369 = vmatpush3.bf16.msra.mxu1 %v410_v5  ;;  %388 = vmatprep.subr.bf16.mxu0 %v425_v0  ;;  %v322_v28 = vld [vmem:[%s558_s4] ss:$0 sm:$0xff] }
   0x9   :  { %370 = vmatprep.subr.bf16.mxu1 %v425_v0  ;;  %v331_v36 = vld [vmem:[%s559_s6] ss:$0 sm:$0xff] }
   0xb   :  { %389 = vmatpush3.bf16.msra.mxu0 %v418_v13 }
   0xc   :  { %371 = vmatpush3.bf16.msra.mxu1 %v411_v6  ;;  %390 = vmatprep.subr.bf16.mxu0 %v425_v0 }
   0xd   :  { %372 = vmatprep.subr.bf16.mxu1 %v425_v0 }
   0xf   :  { %391 = vmatpush3.bf16.msra.mxu0 %v419_v14 }
  0x10   :  { %373 = vmatpush3.bf16.msra.mxu1 %v412_v7  ;;  %392 = vmatprep.subr.bf16.mxu0 %v425_v0 }
  0x11   :  { %374 = vmatprep.subr.bf16.mxu1 %v425_v0 }
  0x13   :  { %393 = vmatpush3.bf16.msra.mxu0 %v420_v15 }
  0x14   :  { %375 = vmatpush3.bf16.msra.mxu1 %v413_v8  ;;  %394 = vmatprep.subr.bf16.mxu0 %v425_v0 }
  0x15   :  { %376 = vmatprep.subr.bf16.mxu1 %v425_v0 }
  0x17   :  { %395 = vmatpush3.bf16.msra.mxu0 %v421_v16 }
  0x18   :  { %377 = vmatpush3.bf16.msra.mxu1 %v414_v9  ;;  %396 = vmatprep.subr.bf16.mxu0 %v425_v0 }
  0x19   :  { %378 = vmatprep.subr.bf16.mxu1 %v425_v0 }
  0x1b   :  { %397 = vmatpush3.bf16.msra.mxu0 %v422_v17 }
  0x1c   :  { %379 = vmatpush3.bf16.msra.mxu1 %v415_v10  ;;  %398 = vmatprep.subr.bf16.mxu0 %v425_v0 }
  0x1d   :  { %380 = vmatprep.subr.bf16.mxu1 %v425_v0 }
  0x1f   :  { %399 = vmatpush3.bf16.msra.mxu0 %v423_v26 }
  0x20   :  { %381 = vmatpush3.bf16.msra.mxu1 %v416_v11  ;;  %400 = vmatprep.subr.bf16.mxu0 %v425_v0 }
  0x23   :  { %401 = vmatpush3.bf16.msra.mxu0 %v424_v27 }
  0xd9   :  { %v82_v19 = vpop.f32.mrb[0].mxu0 }
  0xda   :  { %v83_v20 = vadd.f32 %v319_v18, %v82_v19  ;;  %v364_v21 = vpop.f32.mrb[1].mxu0 }
  0xdb   :  { %v85_v22 = vpop.f32.mrb[2].mxu0 }
  0xdc   :  { %v88_v23 = vmax.f32 %v83_v20, 0.0  ;;  %v365_v24 = vpop.f32.mrb[3].mxu0 }
  0xde   :  { %v89_v25 = vpack.c.bf16 %v88_v23, %v88_v23 }
  0xe0   :  { %383 = vmatmul.mubr.bf16.vlgmr.msra.gmra.mrb[0].mxu1 %v89_v25 }
 0x1b3   :  { %v195_v29 = vpop.f32.mrb[0].mxu1 }
 0x1b4   :  { %v196_v30 = vadd.f32 %v322_v28, %v195_v29  ;;  %v384_v31 = vpop.f32.mrb[1].mxu1 }
 0x1b5   :  { %v198_v32 = vpop.f32.mrb[2].mxu1 }
 0x1b6   :  { %v201_v33 = vmax.f32 %v196_v30, 0.0  ;;  %v385_v34 = vpop.f32.mrb[3].mxu1 }
 0x1b8   :  { %v202_v35 = vpack.c.bf16 %v201_v33, %v201_v33 }
 0x1ba   :  { %403 = vmatmul.mubr.bf16.vlgmr.msra.gmra.mrb[4].mxu0 %v202_v35 }
 0x28d   :  { %v308_v37 = vpop.f32.mrb[4].mxu0 }
 0x28e   :  { %v309_v38 = vadd.f32 %v331_v36, %v308_v37  ;;  %v404_v39 = vpop.f32.mrb[5].mxu0 }
 0x28f   :  { %v311_v40 = vpop.f32.mrb[6].mxu0 }
 0x290   :  { %314 = vst [vmem:[%s560_s7] sm:$0xff] %v309_v38  ;;  %v405_v41 = vpop.f32.mrb[7].mxu0 }

// kernel: _q_forward_impl.1
= control target key start
LH: loop header
LB: loop body
LE: loop exit
PB: predicated region body
PF: predicated region fallthrough
CT: control target
= control target key end

     0   :  { %v425_v0 = vmov 0.0   ;;  %vm426_vm0 = vmmov 0   ;;  %vm44_vm1 = vcmask 130048   ;;  %s553_s1 = inlined_call_operand.vmem [shape: bf16[16,128], index: 1, kind: input, shape index: {}]   ;;  %s554_s0 = inlined_call_operand.vmem [shape: f32[8,16], index: 0, kind: input, shape index: {}]   ;;  %s555_s3 = inlined_call_operand.vmem [shape: bf16[128,128], index: 3, kind: input, shape index: {}]   ;;  %s556_s5 = inlined_call_operand.vmem [shape: bf16[128,128], index: 5, kind: input, shape index: {}]   ;;  %s557_s2 = inlined_call_operand.vmem [shape: f32[1,128], index: 2, kind: input, shape index: {}]   ;;  %s558_s4 = inlined_call_operand.vmem [shape: f32[1,128], index: 4, kind: input, shape index: {}]   ;;  %s559_s6 = inlined_call_operand.vmem [shape: f32[1,128], index: 6, kind: input, shape index: {}]   ;;  %s560_s7 = inlined_call_operand.vmem [shape: f32[8,128], index: 7, kind: output, shape index: {}]  }
   0x1   :  { %360 = vmatprep.subr.bf16.mxu0 %v425_v0  ;;  %v408_v1 = vld [vmem:[%s553_s1] sm:$0xff]   ;;  %362 = vmatprep.mubr.msk.bf16.mxu0 %vm426_vm0, %v425_v0  ;;  %v410_v5 = vld [vmem:[%s555_s3 + $0x8] sm:$0xff]   ;;  %v411_v6 = vld [vmem:[%s555_s3 + $0x10] sm:$0xff]  }
   0x2   :  { %v27_v2 = vld [vmem:[%s554_s0] sm:$0xff]  ;;  %366 = vmatprep.subr.bf16.mxu1 %v425_v0  ;;  %382 = vmatprep.mubr.msk.bf16.mxu1 %vm426_vm0, %v425_v0  ;;  %v412_v7 = vld [vmem:[%s555_s3 + $0x18] sm:$0xff]   ;;  %v414_v9 = vld [vmem:[%s555_s3 + $0x28] sm:$0xff]  }
   0x3   :  { %361 = vmatpush3.bf16.msra.mxu0 %v408_v1  ;;  %v28_v3 = vpack.c.bf16 %v27_v2, %v27_v2  ;;  %v409_v4 = vld [vmem:[%s555_s3] sm:$0xff]   ;;  %v415_v10 = vld [vmem:[%s555_s3 + $0x30] sm:$0xff]   ;;  %v416_v11 = vld [vmem:[%s555_s3 + $0x38] sm:$0xff]  }
   0x4   :  { %386 = vmatprep.subr.bf16.mxu0 %v425_v0  ;;  %367 = vmatpush3.bf16.msra.mxu1 %v409_v4  ;;  %v413_v8 = vld [vmem:[%s555_s3 + $0x20] sm:$0xff]   ;;  %v418_v13 = vld [vmem:[%s556_s5 + $0x8] sm:$0xff]   ;;  %v419_v14 = vld [vmem:[%s556_s5 + $0x10] sm:$0xff]  }
   0x5   :  { %368 = vmatprep.subr.bf16.mxu1 %v425_v0  ;;  %v417_v12 = vld [vmem:[%s556_s5] sm:$0xff]   ;;  %v420_v15 = vld [vmem:[%s556_s5 + $0x18] sm:$0xff]   ;;  %v422_v17 = vld [vmem:[%s556_s5 + $0x28] sm:$0xff]  }
   0x6   :  { %363 = vmatmul.mubr.msk.bf16.vlgmr.msra.gmra.mrb[0].mxu0 %vm44_vm1, %v28_v3  ;;  %v421_v16 = vld [vmem:[%s556_s5 + $0x20] sm:$0xff]   ;;  %v423_v26 = vld [vmem:[%s556_s5 + $0x30] sm:$0xff]   ;;  %v424_v27 = vld [vmem:[%s556_s5 + $0x38] sm:$0xff]  }
   0x7   :  { %402 = vmatprep.mubr.msk.bf16.mxu0 %vm426_vm0, %v425_v0  ;;  %387 = vmatpush3.bf16.msra.mxu0 %v417_v12  ;;  %v319_v18 = vld [vmem:[%s557_s2] ss:$0 sm:$0xff] }
   0x8   :  { %369 = vmatpush3.bf16.msra.mxu1 %v410_v5  ;;  %388 = vmatprep.subr.bf16.mxu0 %v425_v0  ;;  %v322_v28 = vld [vmem:[%s558_s4] ss:$0 sm:$0xff] }
   0x9   :  { %370 = vmatprep.subr.bf16.mxu1 %v425_v0  ;;  %v331_v36 = vld [vmem:[%s559_s6] ss:$0 sm:$0xff] }
   0xb   :  { %389 = vmatpush3.bf16.msra.mxu0 %v418_v13 }
   0xc   :  { %371 = vmatpush3.bf16.msra.mxu1 %v411_v6  ;;  %390 = vmatprep.subr.bf16.mxu0 %v425_v0 }
   0xd   :  { %372 = vmatprep.subr.bf16.mxu1 %v425_v0 }
   0xf   :  { %391 = vmatpush3.bf16.msra.mxu0 %v419_v14 }
  0x10   :  { %373 = vmatpush3.bf16.msra.mxu1 %v412_v7  ;;  %392 = vmatprep.subr.bf16.mxu0 %v425_v0 }
  0x11   :  { %374 = vmatprep.subr.bf16.mxu1 %v425_v0 }
  0x13   :  { %393 = vmatpush3.bf16.msra.mxu0 %v420_v15 }
  0x14   :  { %375 = vmatpush3.bf16.msra.mxu1 %v413_v8  ;;  %394 = vmatprep.subr.bf16.mxu0 %v425_v0 }
  0x15   :  { %376 = vmatprep.subr.bf16.mxu1 %v425_v0 }
  0x17   :  { %395 = vmatpush3.bf16.msra.mxu0 %v421_v16 }
  0x18   :  { %377 = vmatpush3.bf16.msra.mxu1 %v414_v9  ;;  %396 = vmatprep.subr.bf16.mxu0 %v425_v0 }
  0x19   :  { %378 = vmatprep.subr.bf16.mxu1 %v425_v0 }
  0x1b   :  { %397 = vmatpush3.bf16.msra.mxu0 %v422_v17 }
  0x1c   :  { %379 = vmatpush3.bf16.msra.mxu1 %v415_v10  ;;  %398 = vmatprep.subr.bf16.mxu0 %v425_v0 }
  0x1d   :  { %380 = vmatprep.subr.bf16.mxu1 %v425_v0 }
  0x1f   :  { %399 = vmatpush3.bf16.msra.mxu0 %v423_v26 }
  0x20   :  { %381 = vmatpush3.bf16.msra.mxu1 %v416_v11  ;;  %400 = vmatprep.subr.bf16.mxu0 %v425_v0 }
  0x23   :  { %401 = vmatpush3.bf16.msra.mxu0 %v424_v27 }
  0xd9   :  { %v82_v19 = vpop.f32.mrb[0].mxu0 }
  0xda   :  { %v83_v20 = vadd.f32 %v319_v18, %v82_v19  ;;  %v364_v21 = vpop.f32.mrb[1].mxu0 }
  0xdb   :  { %v85_v22 = vpop.f32.mrb[2].mxu0 }
  0xdc   :  { %v88_v23 = vmax.f32 %v83_v20, 0.0  ;;  %v365_v24 = vpop.f32.mrb[3].mxu0 }
  0xde   :  { %v89_v25 = vpack.c.bf16 %v88_v23, %v88_v23 }
  0xe0   :  { %383 = vmatmul.mubr.bf16.vlgmr.msra.gmra.mrb[0].mxu1 %v89_v25 }
 0x1b3   :  { %v195_v29 = vpop.f32.mrb[0].mxu1 }
 0x1b4   :  { %v196_v30 = vadd.f32 %v322_v28, %v195_v29  ;;  %v384_v31 = vpop.f32.mrb[1].mxu1 }
 0x1b5   :  { %v198_v32 = vpop.f32.mrb[2].mxu1 }
 0x1b6   :  { %v201_v33 = vmax.f32 %v196_v30, 0.0  ;;  %v385_v34 = vpop.f32.mrb[3].mxu1 }
 0x1b8   :  { %v202_v35 = vpack.c.bf16 %v201_v33, %v201_v33 }
 0x1ba   :  { %403 = vmatmul.mubr.bf16.vlgmr.msra.gmra.mrb[4].mxu0 %v202_v35 }
 0x28d   :  { %v308_v37 = vpop.f32.mrb[4].mxu0 }
 0x28e   :  { %v309_v38 = vadd.f32 %v331_v36, %v308_v37  ;;  %v404_v39 = vpop.f32.mrb[5].mxu0 }
 0x28f   :  { %v311_v40 = vpop.f32.mrb[6].mxu0 }
 0x290   :  { %314 = vst [vmem:[%s560_s7] sm:$0xff] %v309_v38  ;;  %v405_v41 = vpop.f32.mrb[7].mxu0 }

</bundles_post_ra>
